<compile_context>
chip_gen: v7x
topology: tpu7x:2x2x1
jax: 0.10.0
libtpu: 0.0.40
codegen_flags: <defaults>
</compile_context>

<pallas_src>
import functools
import math

import jax
import jax.numpy as jnp
from jax.experimental import pallas as pl
from jax.experimental.pallas import tpu as pltpu


def _moving_avg_kernel(x_ref, o_ref, *scratch, kernel_size: int, stride: int,
                       pad_front: int, pad_end: int, seq_len: int, out_len: int):
    """x_ref: (TB, L, TC) VMEM tile; o_ref: (TB, L_out, TC); optional scratch[0]: (TB, L_pad, TC)."""
    TB = x_ref.shape[0]
    TC = x_ref.shape[2]
    needs_pad = (pad_front > 0) or (pad_end > 0)

    if needs_pad:
        xpad_ref = scratch[0]
        # Rebuild the replicate-padded series entirely in VMEM (no HBM x_pad copy).
        xpad_ref[:, pl.ds(pad_front, seq_len), :] = x_ref[...]
        if pad_front > 0:
            first = x_ref[:, 0:1, :]
            xpad_ref[:, pl.ds(0, pad_front), :] = jnp.broadcast_to(
                first, (TB, pad_front, TC))
        if pad_end > 0:
            last = x_ref[:, seq_len - 1:seq_len, :]
            xpad_ref[:, pl.ds(pad_front + seq_len, pad_end), :] = jnp.broadcast_to(
                last, (TB, pad_end, TC))
        src = xpad_ref
    else:
        src = x_ref

    inv_k = 1.0 / float(kernel_size)

    def window(j):
        if stride == 1:
            return src[:, pl.ds(j, out_len), :]
        # Strided sublane read; stride is almost always 1 for this module.
        return src[:, pl.ds(j, out_len, stride=stride), :]

    # Unrolled sum of k shifted windows; f32 accumulation; first window seeds acc.
    acc = window(0).astype(jnp.float32)
    for j in range(1, kernel_size):
        acc = acc + window(j).astype(jnp.float32)

    o_ref[...] = (acc * inv_k).astype(o_ref.dtype)


def _choose_tiles(B, C, L, L_pad, L_out, itemsize):
    """Pick (TB, TC): lane-dense channel tiles, VMEM-budgeted batch folding."""
    budget = 6 * 1024 * 1024  # per-block working-set target (comfortable on v7x's 64 MiB VMEM)

    def block_bytes(tb, tc):
        # double-buffered input + output tiles, plus the single in-kernel pad scratch
        return itemsize * tb * tc * (2 * L + 2 * L_out + L_pad)

    # Channel tile: biggest multiple-of-128 divisor of C (<= 512) that fits; else full C.
    tc_cands = [c for c in (512, 384, 256, 128) if C >= c and C % c == 0] or [C]
    TC = tc_cands[-1]
    for tc in tc_cands:
        if block_bytes(1, tc) <= budget:
            TC = tc
            break

    # Batch tile: largest divisor of B that keeps the block inside the budget.
    TB = 1
    for tb in range(B, 0, -1):
        if B % tb == 0 and block_bytes(tb, TC) <= budget:
            TB = tb
            break

    # Megacore: expose >= 2 parallel grid steps whenever the problem allows.
    if (B // TB) * (C // TC) < 2 and B > 1:
        for tb in range(TB - 1, 0, -1):
            if B % tb == 0:
                TB = tb
                break

    return TB, TC


def moving_avg(x, kernel_size: int, stride: int):
    """x: [B, L, C] float array. Returns [B, L_out, C] (AvgPool1d over replicate-padded time)."""
    B, L, C = x.shape
    pad_front = kernel_size - 1 - math.floor((kernel_size - 1) // 2)
    pad_end = math.floor((kernel_size - 1) // 2)
    L_pad = L + pad_front + pad_end
    L_out = (L_pad - kernel_size) // stride + 1  # AvgPool1d, padding=0
    needs_pad = (pad_front > 0) or (pad_end > 0)

    itemsize = jnp.dtype(x.dtype).itemsize
    TB, TC = _choose_tiles(B, C, L, L_pad, L_out, itemsize)

    # TODO(synk): for extremely long sequences (L*TC blocks beyond the VMEM budget)
    # add halo-carrying time-axis tiles; full-L blocks cover typical decomposition sizes.

    kernel = functools.partial(
        _moving_avg_kernel,
        kernel_size=kernel_size, stride=stride,
        pad_front=pad_front, pad_end=pad_end,
        seq_len=L, out_len=L_out,
    )

    scratch_shapes = (
        [pltpu.VMEM((TB, L_pad, TC), x.dtype)] if needs_pad else []
    )

    return pl.pallas_call(
        kernel,
        out_shape=jax.ShapeDtypeStruct((B, L_out, C), x.dtype),
        grid_spec=pltpu.PrefetchScalarGridSpec(
            num_scalar_prefetch=0,
            grid=(B // TB, C // TC),
            in_specs=[pl.BlockSpec((TB, L, TC), lambda b, c: (b, 0, c))],
            out_specs=pl.BlockSpec((TB, L_out, TC), lambda b, c: (b, 0, c)),
            scratch_shapes=scratch_shapes,
        ),
        compiler_params=pltpu.CompilerParams(
            dimension_semantics=("parallel", "parallel"),
            vmem_limit_bytes=32 * 1024 * 1024,
        ),
    )(x)


def _reference(x, kernel_size, stride):
    # Pure-JAX reference mirroring the PyTorch forward.
    pad_front = kernel_size - 1 - math.floor((kernel_size - 1) // 2)
    pad_end = math.floor((kernel_size - 1) // 2)
    front = jnp.repeat(x[:, 0:1, :], pad_front, axis=1)
    end = jnp.repeat(x[:, -1:, :], pad_end, axis=1)
    xp = jnp.concatenate([front, x, end], axis=1)
    L_pad = xp.shape[1]
    L_out = (L_pad - kernel_size) // stride + 1
    outs = []
    for t in range(L_out):
        outs.append(jnp.mean(xp[:, t * stride: t * stride + kernel_size, :], axis=1))
    return jnp.stack(outs, axis=1)


if __name__ == "__main__":
    # moving_avg has no learnable parameters (AvgPool1d only).
    B, L, C = 2, 16, 32  # [batch, seq_len, channels]
    key = jax.random.PRNGKey(0)
    x = jax.random.normal(key, (B, L, C), dtype=jnp.float32)

    # Odd kernel (symmetric pad), even kernel (asymmetric pad), stride 2, and the
    # degenerate no-pad case exercise every code path.
    for kernel_size, stride in ((5, 1), (4, 1), (3, 2), (1, 1)):
        out = jax.block_until_ready(moving_avg(x, kernel_size, stride))
        ref = _reference(x, kernel_size, stride)
        assert out.shape == ref.shape, (kernel_size, stride, out.shape, ref.shape)
        assert jnp.allclose(out, ref, atol=1e-5, rtol=1e-5), (kernel_size, stride)

    print("KERNEL_OK")
</pallas_src>

<mosaic_0001>
module attributes {stable_mosaic.version = 11 : i64} {
  func.func @_moving_avg_kernel(%arg0: i32, %arg1: i32, %arg2: memref<1x16x32xf32, #tpu.memory_space<vmem>>, %arg3: memref<1x16x32xf32, #tpu.memory_space<vmem>>, %arg4: memref<1x20x32xf32, #tpu.memory_space<vmem>>) attributes {dimension_semantics = [#tpu.dimension_semantics<parallel>, #tpu.dimension_semantics<parallel>], iteration_bounds = array<i64: 2, 1>, scalar_prefetch = 0 : i64, scratch_operands = 1 : i64, tpu.core_type = #tpu.core_type<tc>, window_params = [{transform_indices = @transform_0, window_bounds = array<i64: 1, 16, 32>}, {transform_indices = @transform_1, window_bounds = array<i64: 1, 16, 32>}]} {
    %c0 = arith.constant 0 : index
    %c0_0 = arith.constant 0 : index
    %c0_1 = arith.constant 0 : index
    %0 = vector.load %arg2[%c0, %c0_0, %c0_1] : memref<1x16x32xf32, #tpu.memory_space<vmem>>, vector<1x16x32xf32>
    %c0_2 = arith.constant 0 : index
    %c2 = arith.constant 2 : index
    %c0_3 = arith.constant 0 : index
    %1 = vector.load %arg4[%c0_2, %c2, %c0_3] : memref<1x20x32xf32, #tpu.memory_space<vmem>>, vector<1x16x32xf32>
    tpu.vector_store %arg4[%c0_2, %c2, %c0_3], %0 {strides = array<i32>} : memref<1x20x32xf32, #tpu.memory_space<vmem>>, vector<1x16x32xf32>,
    %c0_4 = arith.constant 0 : index
    %c0_5 = arith.constant 0 : index
    %c0_6 = arith.constant 0 : index
    %2 = vector.load %arg2[%c0_4, %c0_5, %c0_6] : memref<1x16x32xf32, #tpu.memory_space<vmem>>, vector<1x1x32xf32>
    %3 = vector.shape_cast %2 : vector<1x1x32xf32> to vector<1x1x32xf32>
    %4 = vector.broadcast %3 : vector<1x1x32xf32> to vector<1x2x32xf32>
    %c0_7 = arith.constant 0 : index
    %c0_8 = arith.constant 0 : index
    %c0_9 = arith.constant 0 : index
    %5 = vector.load %arg4[%c0_7, %c0_8, %c0_9] : memref<1x20x32xf32, #tpu.memory_space<vmem>>, vector<1x2x32xf32>
    tpu.vector_store %arg4[%c0_7, %c0_8, %c0_9], %4 {strides = array<i32>} : memref<1x20x32xf32, #tpu.memory_space<vmem>>, vector<1x2x32xf32>,
    %c0_10 = arith.constant 0 : index
    %c15 = arith.constant 15 : index
    %c0_11 = arith.constant 0 : index
    %6 = vector.load %arg2[%c0_10, %c15, %c0_11] : memref<1x16x32xf32, #tpu.memory_space<vmem>>, vector<1x1x32xf32>
    %7 = vector.shape_cast %6 : vector<1x1x32xf32> to vector<1x1x32xf32>
    %8 = vector.broadcast %7 : vector<1x1x32xf32> to vector<1x2x32xf32>
    %c0_12 = arith.constant 0 : index
    %c18 = arith.constant 18 : index
    %c0_13 = arith.constant 0 : index
    %9 = vector.load %arg4[%c0_12, %c18, %c0_13] : memref<1x20x32xf32, #tpu.memory_space<vmem>>, vector<1x2x32xf32>
    tpu.vector_store %arg4[%c0_12, %c18, %c0_13], %8 {strides = array<i32>} : memref<1x20x32xf32, #tpu.memory_space<vmem>>, vector<1x2x32xf32>,
    %c0_14 = arith.constant 0 : index
    %c0_15 = arith.constant 0 : index
    %c0_16 = arith.constant 0 : index
    %10 = vector.load %arg4[%c0_14, %c0_15, %c0_16] : memref<1x20x32xf32, #tpu.memory_space<vmem>>, vector<1x16x32xf32>
    %c0_17 = arith.constant 0 : index
    %c1 = arith.constant 1 : index
    %c0_18 = arith.constant 0 : index
    %11 = vector.load %arg4[%c0_17, %c1, %c0_18] : memref<1x20x32xf32, #tpu.memory_space<vmem>>, vector<1x16x32xf32>
    %12 = arith.addf %10, %11 : vector<1x16x32xf32>
    %c0_19 = arith.constant 0 : index
    %c2_20 = arith.constant 2 : index
    %c0_21 = arith.constant 0 : index
    %13 = vector.load %arg4[%c0_19, %c2_20, %c0_21] : memref<1x20x32xf32, #tpu.memory_space<vmem>>, vector<1x16x32xf32>
    %14 = arith.addf %12, %13 : vector<1x16x32xf32>
    %c0_22 = arith.constant 0 : index
    %c3 = arith.constant 3 : index
    %c0_23 = arith.constant 0 : index
    %15 = vector.load %arg4[%c0_22, %c3, %c0_23] : memref<1x20x32xf32, #tpu.memory_space<vmem>>, vector<1x16x32xf32>
    %16 = arith.addf %14, %15 : vector<1x16x32xf32>
    %c0_24 = arith.constant 0 : index
    %c4 = arith.constant 4 : index
    %c0_25 = arith.constant 0 : index
    %17 = vector.load %arg4[%c0_24, %c4, %c0_25] : memref<1x20x32xf32, #tpu.memory_space<vmem>>, vector<1x16x32xf32>
    %18 = arith.addf %16, %17 : vector<1x16x32xf32>
    %cst = arith.constant 2.000000e-01 : f32
    %19 = vector.broadcast %cst : f32 to vector<1x16x32xf32>
    %20 = arith.mulf %18, %19 : vector<1x16x32xf32>
    %c0_26 = arith.constant 0 : index
    %c0_27 = arith.constant 0 : index
    %c0_28 = arith.constant 0 : index
    %21 = vector.load %arg3[%c0_26, %c0_27, %c0_28] : memref<1x16x32xf32, #tpu.memory_space<vmem>>, vector<1x16x32xf32>
    tpu.vector_store %arg3[%c0_26, %c0_27, %c0_28], %20 {strides = array<i32>} : memref<1x16x32xf32, #tpu.memory_space<vmem>>, vector<1x16x32xf32>,
    return
  }
  func.func @transform_0(%arg0: i32, %arg1: i32) -> (i32, i32, i32) {
    %c0_i32 = arith.constant 0 : i32
    %c0_i32_0 = arith.constant 0 : i32
    return %arg0, %c0_i32, %arg1 : i32, i32, i32
  }
  func.func @transform_1(%arg0: i32, %arg1: i32) -> (i32, i32, i32) {
    %c0_i32 = arith.constant 0 : i32
    %c0_i32_0 = arith.constant 0 : i32
    return %arg0, %c0_i32, %arg1 : i32, i32, i32
  }
}

</mosaic_0001>

<bundles_post_ra>
// kernel: tpu_custom_call.1
= control target key start
LH: loop header
LB: loop body
LE: loop exit
PB: predicated region body
PF: predicated region fallthrough
CT: control target
= control target key end

     0   :  { %6 = vsyncpa [#allocation4], 0  ;;  %s686_s0 = inlined_call_operand.hbm [shape: f32[2,16,32], index: 0, kind: input, shape index: {}]   ;;  %s687_s1 = inlined_call_operand.hbm [shape: f32[2,16,32], index: 1, kind: output, shape index: {}]  }
   0x1   :  { %8 = vsyncpa [#allocation4 + $0x1], 0 }
   0x2   :  { %9 = vsyncpa [#allocation5], 0 }
   0x3   :  { %11 = vsyncpa [#allocation5 + $0x1], 0  ;;  %s507_s6 = smov 0   ;;  %s509_s7 = smov 0  }
   0x4   :  { %s511_s8 = smov 0   ;;  %s513_s9 = smov 0  }
   0x5   :  { %s515_s10 = smov 0   ;;  %s517_s11 = smov 0  }
   0x6 LB: > { %s292_s12 = sadd.s32 4294967295, %s489_s11   ;;  %s293_s13 = sadd.s32 4294967294, %s489_s11   ;;  %s489_s11 = sphi %s517_s11, %s17_s11   ;;  %s485_s10 = sphi %s515_s10, %s702_s10   ;;  %s481_s9 = sphi %s513_s9, %s701_s9   ;;  %s477_s8 = sphi %s511_s8, %s700_s8   ;;  %s473_s7 = sphi %s509_s7, %s699_s7   ;;  %s469_s6 = sphi %s507_s6, %s698_s6  }
   0x7   : > { %s29_s14 = sadd.s32 1, %s485_s10  ;;  %s38_s15 = sadd.s32 1, %s477_s8 }
   0x8   : > { %p31_p0 = scmp.ge.s32.totalorder %s29_s14, 2  ;;  %p45_p1 = scmp.ne.s32.totalorder %s477_s8, %s473_s7 }
   0x9   : > { %p46_p2 = scmp.eq.s32.totalorder %s489_s11, 0  ;;  %p51_p3 = scmp.ne.s32.totalorder %s473_s7, %s469_s6 }
   0xa   : > { %s704_s14 = smov (%p31_p0, %s29_s14), 0  ;;  %p52_p5 = scmp.eq.s32.totalorder %s292_s12, 0 }
   0xb   : > { %p548_p4 = por %p46_p2, %p45_p1  ;;  %s33_s17 = ssub.s32 %s485_s10, %s704_s14 }
   0xc   : > { %p77_p6 = scmp.eq.s32.totalorder %s292_s12, 1  ;;  %p36_p7 = scmp.eq.s32.totalorder %s33_s17, 0 }
   0xd   : > { %p554_p8 = por %p52_p5, %p51_p3  ;;  %p83_p10 = scmp.eq.s32.totalorder %s293_s13, 1 }
   0xe   : > { %p558_p9 = por %p77_p6, %p45_p1  ;;  %p323_p13 = scmp.lt.s32.totalorder %s489_s11, 2 }
   0xf   : > { %s563_s20 = scalar_select %p36_p7, %s477_s8, %s38_s15  }
  0x10   : > { %s691_s19 = scalar_select %p558_p9, 1, 0 }
  0x11   : > { %p565_p11 = por %p83_p10, %p51_p3  ;;  %s103_s22 = sand.u32 1, %s477_s8  }
  0x12   : > { %s296_s23 = sshll.u32 %s103_s22, 4  ;;  %s309_s24 = sshll.u32 %s485_s10, 8 }
  0x13   : > { %s692_s21 = scalar_select %p565_p11, 1, 0 }
  0x14   : > { %s576_s27 = scalar_lea.hbm %s686_s0, %s309_s24  ;;  %s107_s28 = scalar_lea.vmem [#allocation3], %s296_s23 }
  0x15   : > { %s115_s29 = sshll.u32 %s107_s28, 4  ;;  %p582_p0 = pnand %p323_p13, %p548_p4  ;;  %s578_s29 = int_to_ptr.vmem [resolvable:$true] %s115_s29 }
  0x16   : > { %s587_s2 = scalar_lea.sflag [#allocation4], %s103_s22  ;;  %s377_s3 = scalar_lea.hbm %s576_s27, 256 }
  0x17   : > { %p378_p2 = scmp.ne.s32.totalorder %s576_s27, %s377_s3  ;;  %p379_p3 = pneg %p582_p0 }
  0x18   : > { %s382_s12 = scalar_lea.hbm %s686_s0, 512  ;;  %p383_p4 = scmp.lt.u32.totalorder %s576_s27, %s686_s0 }
  0x19   : > { %p380_p5 = pnand %p379_p3, %p378_p2  ;;  %p384_p7 = scmp.lt.u32.totalorder %s382_s12, %s377_s3 }
  0x1a   : > { %p386_p13 = scmp.lt.u32.totalorder %s377_s3, %s576_s27 }
  0x1b   : > { %p381_p6 = pneg %p380_p5  ;;  %p385_p10 = por %p384_p7, %p383_p4 }
  0x1d   : > { %p387_p12 = por %p386_p13, %p385_p10 }
  0x1f   : > { %p388_p1 = pnand %p387_p12, %p381_p6 }
  0x21   : > { %391 = shalt.err (!%p388_p1)
}
  0x22   : > { %s392_s16 = scalar_lea.vmem %s578_s29, 256  ;;  %s491_s17 = smov [#allocation3]  }
  0x23   : > { %p393_p2 = scmp.ne.s32.totalorder %s578_s29, %s392_s16  ;;  %s397_s22 = sshll.u32 %s491_s17, 4  ;;  %s398_s22 = int_to_ptr.vmem [resolvable:$false] %s397_s22 }
  0x24   : > { %s399_s23 = scalar_lea.vmem %s398_s22, 512  ;;  %p400_p9 = scmp.lt.s32.totalorder %s578_s29, %s398_s22 }
  0x25   : > { %p395_p5 = pnand %p393_p2, %p379_p3  ;;  %p401_p4 = scmp.lt.s32.totalorder %s399_s23, %s392_s16 }
  0x27   : > { %p396_p11 = pneg %p395_p5  ;;  %p402_p7 = por %p401_p4, %p400_p9 }
  0x29   : > { %p403_p10 = pnand %p402_p7, %p396_p11 }
  0x2b   : > { %406 = shalt.err (!%p403_p10)
}
  0x2c   : > { %s492_s24 = smov 128   ;;  %s493_s25 = smov 8  }
  0x2d   : > { %318 = dma.hbm_to_vmem [thread:$0]  (!%p582_p0), %s576_s27, 256, %s578_s29, %s587_s2, %s492_s24, %s492_s24, %s493_s25  }
  0x2e   : > { %p123_p12 = scmp.lt.s32.totalorder %s489_s11, 3  ;;  %p694_p1 = scmp.ge.s32.totalorder %s489_s11, 1 }
  0x30   : > { %p124_p3 = pnand %p694_p1, %p123_p12 }
  0x31   : > { %s619_s26 = sand.u32 (!%p124_p3), 1, %s473_s7  }
  0x32   : > { %127 = sbr.rel (%p124_p3) target bundleno = 94 (0x5e), region = 24  ;;  %s300_s28 = sshll.u32 (!%p124_p3), %s619_s26, 4 }
  0x33   : > { %s130_s3 = scalar_lea.sflag (!%p124_p3), [#allocation4], %s619_s26  ;;  %s133_s4 = scalar_lea.vmem (!%p124_p3), [#allocation3], %s300_s28 }
  0x39   : > { %460 = dma.done.wait (%p554_p8), %s130_s3, 256  }
  0x3a   : > { %462 = vsyncadd (%p554_p8), %s130_s3, 4294967040  ;;  %vm154_vm0 = vcmask 261120   ;;  %vm162_vm1 = vcmask 254976   ;;  %v152_v0 = vld [vmem:[%s133_s4] sm:$0xff]  ;;  %v153_v1 = vld [vmem:[%s133_s4 + $0x8] sm:$0xff]  ;;  %s151_s18 = scalar_lea.vmem [#allocation6], %s300_s28 }
  0x3b   : > { %v302_v2 = vld [vmem:[%s133_s4] ss:$0 sm:$0xff]  ;;  %155 = vst.msk [vmem:[#allocation2 + $0x2] sm:$0xff] %vm154_vm0, %v152_v0  ;;  %156 = vst.msk [vmem:[#allocation2 + $0xa] sm:$0xff] %vm154_vm0, %v153_v1  ;;  %v303_v3 = vld [vmem:[%s133_s4 + $0xf] ss:$0 sm:$0xff] }
  0x3c   : > { %163 = vst.msk [vmem:[#allocation2] sm:$0x3] %vm162_vm1, %v302_v2  ;;  %169 = vst.msk [vmem:[#allocation2 + $0x12] sm:$0x3] %vm162_vm1, %v303_v3  ;;  %s207_s27 = sshll.u32 %s151_s18, 4  ;;  %s310_s29 = sshll.u32 %s481_s9, 8  ;;  %s630_s27 = int_to_ptr.vmem [resolvable:$true] %s207_s27 }
  0x3d   : > { %s635_s5 = scalar_lea.hbm %s687_s1, %s310_s29  ;;  %s193_s12 = scalar_lea.sflag [#allocation5], %s619_s26 }
  0x3e   : > { %s407_s9 = scalar_lea.vmem %s630_s27, 256  ;;  %p695_p9 = scmp.ne.s32.totalorder %s691_s19, 0 }
  0x3f   : > { %p408_p8 = scmp.ne.s32.totalorder %s630_s27, %s407_s9  ;;  %s494_s13 = smov [#allocation6]  }
  0x40   : > { %s411_s15 = sshll.u32 %s494_s13, 4  ;;  %s412_s15 = int_to_ptr.vmem [resolvable:$false] %s411_s15 }
  0x41   : > { %p409_p11 = pnand %p408_p8, %p695_p9  ;;  %s413_s16 = scalar_lea.vmem %s412_s15, 512 }
  0x42   : > { %v171_v7 = vld [vmem:[#allocation2 + $0x8] sm:$0xff]  ;;  %p414_p6 = scmp.lt.s32.totalorder %s630_s27, %s412_s15  ;;  %p415_p13 = scmp.lt.s32.totalorder %s413_s16, %s407_s9 }
  0x43   : > { %v170_v4 = vld [vmem:[#allocation2] sm:$0xff]  ;;  %v173_v9 = vld [vmem:[#allocation2 + $0x9] sm:$0xff]  ;;  %p410_p0 = pneg %p409_p11 }
  0x44   : > { %v172_v5 = vld [vmem:[#allocation2 + $0x1] sm:$0xff]  ;;  %v175_v11 = vadd.f32 %v173_v9, %v171_v7  ;;  %v177_v13 = vld [vmem:[#allocation2 + $0xa] sm:$0xff]  ;;  %p416_p2 = por %p415_p13, %p414_p6 }
  0x45   : > { %v174_v6 = vadd.f32 %v172_v5, %v170_v4  ;;  %v176_v8 = vld [vmem:[#allocation2 + $0x2] sm:$0xff]  ;;  %v181_v17 = vld [vmem:[#allocation2 + $0xb] sm:$0xff] }
  0x46   : > { %v180_v12 = vld [vmem:[#allocation2 + $0x3] sm:$0xff]  ;;  %v179_v15 = vadd.f32 %v177_v13, %v175_v11  ;;  %v185_v20 = vld [vmem:[#allocation2 + $0xc] sm:$0xff]  ;;  %p417_p5 = pnand %p416_p2, %p410_p0 }
  0x47   : > { %v178_v10 = vadd.f32 %v176_v8, %v174_v6  ;;  %v184_v16 = vld [vmem:[#allocation2 + $0x4] sm:$0xff] }
  0x48   : > { %v183_v19 = vadd.f32 %v181_v17, %v179_v15 }
  0x49   : > { %v182_v14 = vadd.f32 %v180_v12, %v178_v10 }
  0x4a   : > { %v187_v22 = vadd.f32 %v185_v20, %v183_v19 }
  0x4b   : > { %v186_v18 = vadd.f32 %v184_v16, %v182_v14 }
  0x4c   : > { %v189_v23 = vmul.f32 0.2, %v187_v22 }
  0x4d   : > { %v188_v21 = vmul.f32 0.2, %v186_v18 }
  0x4e   : > { %191 = vst.msk [vmem:[%s151_s18 + $0x8] sm:$0xff] %vm154_vm0, %v189_v23 }
  0x4f   : > { %190 = vst.msk [vmem:[%s151_s18] sm:$0xff] %vm154_vm0, %v188_v21 }
  0x50   : > { %420 = shalt.err (!%p417_p5)
}
  0x51   : > { %s421_s17 = scalar_lea.hbm %s635_s5, 256  ;;  %s425_s24 = scalar_lea.hbm %s687_s1, 512 }
  0x52   : > { %p422_p4 = scmp.ne.s32.totalorder %s635_s5, %s421_s17  ;;  %p426_p12 = scmp.lt.u32.totalorder %s635_s5, %s687_s1 }
  0x53   : > { %p427_p1 = scmp.lt.u32.totalorder %s425_s24, %s421_s17  ;;  %p429_p8 = scmp.lt.u32.totalorder %s421_s17, %s635_s5 }
  0x54   : > { %p423_p7 = pnand %p422_p4, %p695_p9 }
  0x55   : > { %p428_p3 = por %p427_p1, %p426_p12 }
  0x56   : > { %p424_p10 = pneg %p423_p7 }
  0x57   : > { %p430_p11 = por %p429_p8, %p428_p3 }
  0x59   : > { %p431_p0 = pnand %p430_p11, %p424_p10 }
  0x5b   : > { %434 = shalt.err (!%p431_p0)
}
  0x5c   : > { %s495_s3 = smov 128   ;;  %s496_s4 = smov 8  }
  0x5d   : > { %313 = dma.vmem_to_hbm [thread:$0]  (%p695_p9), %s630_s27, 256, %s635_s5, %s193_s12, %s495_s3, %s495_s3, %s496_s4  }
  0x5e PF: > { %s222_s18 = sand.u32 1, %s469_s6   ;;  %p696_p6 = scmp.ne.s32.totalorder %s692_s21, 0 }
  0x5f   : > { %p697_p13 = scmp.ge.s32.totalorder %s489_s11, 2  ;;  %s223_s29 = scalar_lea.sflag [#allocation5], %s222_s18 }
  0x61   : > { %p320_p2 = pnand %p697_p13, %p696_p6 }
  0x63   : > { %464 = dma.done.wait (!%p320_p2), %s223_s29, 256  }
  0x64   : > { %466 = vsyncadd (!%p320_p2), %s223_s29, 4294967040  ;;  %s17_s11 = sadd.s32 1, %s489_s11   ;;  %s698_s6 = smov %s473_s7 }
  0x65   : > { %p14_p5 = scmp.ge.s32.totalorder %s17_s11, 4   ;;  %s699_s7 = smov %s477_s8 }
  0x66   : > { %s700_s8 = smov %s563_s20  ;;  %s701_s9 = smov %s485_s10 }
  0x67   : > { %s702_s10 = smov %s704_s14  ;;  %16 = sbr.rel (!%p14_p5) target bundleno = 6 (0x6), region = 69 }
  0x6e   :  { %228 = vsyncpa [#allocation4], 1 }
  0x6f   :  { %230 = vsyncpa [#allocation4 + $0x1], 1 }
  0x70   :  { %231 = vsyncpa [#allocation5], 1 }
  0x71   :  { %233 = vsyncpa [#allocation5 + $0x1], 1 }

</bundles_post_ra>
